<compile_context>
chip_gen: v6e
topology: v6e:2x2x1
jax: 0.10.0
libtpu: 0.0.40
codegen_flags: <defaults>
</compile_context>

<pallas_src>
import functools

import jax
import jax.numpy as jnp
from jax.experimental import pallas as pl
from jax.experimental.pallas import tpu as pltpu


_LANE = 128          # TPU lane width
_MAX_TILE_N = 4096   # lanes per grid step (per-step VMEM stays tiny)


def _binary_loss_kernel(packed_ref, out_ref, acc_ref, *, n_total, inv_n, tile_n):
    """One grid step over a lane-dense (2, tile_n) chunk of packed logits.

    Row 0 holds the "wrong-class" logit, row 1 the "right-class" logit for
    every sample, so the per-sample loss is softplus(row0 - row1).
    """
    i = pl.program_id(0)

    @pl.when(i == 0)
    def _():
        acc_ref[...] = jnp.zeros_like(acc_ref)

    x = packed_ref[...].astype(jnp.float32)          # (2, tile_n), f32 math
    d = x[0:1, :] - x[1:2, :]                        # (1, tile_n)
    # Stable softplus == logaddexp(0, d): one exp + one log1p on the EUP.
    sp = jnp.maximum(d, 0.0) + jnp.log1p(jnp.exp(-jnp.abs(d)))

    # Zero out lanes that are padding beyond the true sample count.
    lane = jax.lax.broadcasted_iota(jnp.int32, sp.shape, 1) + i * tile_n
    acc_ref[...] += jnp.where(lane < n_total, sp, 0.0)

    @pl.when(i == pl.num_programs(0) - 1)
    def _():
        out_ref[0, 0] = jnp.sum(acc_ref[...]) * jnp.float32(inv_n)


def binary_loss(pos_score, neg_score):
    """Pallas TPU implementation of BinaryLoss.forward.

    pos_score: (N_pos, 2) logits, column 1 is the "positive" class.
    neg_score: (N_neg, 2) logits, column 0 is the "negative" class.
    Returns a float32 scalar.
    """
    n_pos, c_pos = pos_score.shape
    n_neg, c_neg = neg_score.shape
    assert c_pos == 2 and c_neg == 2, "BinaryLoss expects 2-class logits"
    n_total = n_pos + n_neg
    inv_n = 1.0 / float(n_total)

    # Lane-dense packing (layout plumbing only, no compute hoisting):
    #   pos loss = softplus(x0 - x1) -> row0 = x[:, 0], row1 = x[:, 1]
    #   neg loss = softplus(x1 - x0) -> row0 = x[:, 1], row1 = x[:, 0]
    top = jnp.concatenate([pos_score[:, 0], neg_score[:, 1]])
    bot = jnp.concatenate([pos_score[:, 1], neg_score[:, 0]])
    packed = jnp.stack([top, bot], axis=0)           # (2, n_total), input dtype

    n_pad128 = pl.cdiv(n_total, _LANE) * _LANE
    tile_n = n_pad128 if n_pad128 <= _MAX_TILE_N else _MAX_TILE_N
    n_padded = pl.cdiv(n_total, tile_n) * tile_n
    if n_padded != n_total:
        packed = jnp.pad(packed, ((0, 0), (0, n_padded - n_total)))
    num_tiles = n_padded // tile_n

    kernel = functools.partial(
        _binary_loss_kernel, n_total=n_total, inv_n=inv_n, tile_n=tile_n)

    out = pl.pallas_call(
        kernel,
        out_shape=jax.ShapeDtypeStruct((1, 1), jnp.float32),
        grid_spec=pltpu.PrefetchScalarGridSpec(
            num_scalar_prefetch=0,
            grid=(num_tiles,),
            in_specs=[pl.BlockSpec((2, tile_n), lambda i: (0, i))],
            out_specs=pl.BlockSpec(memory_space=pltpu.SMEM),
            scratch_shapes=[pltpu.VMEM((1, tile_n), jnp.float32)],
        ),
        compiler_params=pltpu.CompilerParams(
            dimension_semantics=("arbitrary",),
            vmem_limit_bytes=32 * 1024 * 1024,
        ),
    )(packed)
    return out[0, 0]


def binary_loss_ref(pos_score, neg_score):
    """Pure-JAX reference for correctness check."""
    pos_logp = jax.nn.log_softmax(pos_score.astype(jnp.float32), axis=1)
    neg_logp = jax.nn.log_softmax(neg_score.astype(jnp.float32), axis=1)
    pos_loss = -pos_logp[:, 1]
    neg_loss = -neg_logp[:, 0]
    return (pos_loss.sum() + neg_loss.sum()) / (pos_loss.shape[0] + neg_loss.shape[0])


if __name__ == "__main__":
    key = jax.random.PRNGKey(0)
    k1, k2, k3, k4 = jax.random.split(key, 4)

    # Small shapes consistent with the module: (N, 2) class logits.
    pos_score = jax.random.normal(k1, (8, 2), dtype=jnp.float32)
    neg_score = jax.random.normal(k2, (16, 2), dtype=jnp.float32)

    loss = binary_loss(pos_score, neg_score)
    jax.block_until_ready(loss)
    ref = binary_loss_ref(pos_score, neg_score)
    assert jnp.allclose(loss, ref, rtol=1e-5, atol=1e-5), (loss, ref)

    # Larger case exercising the multi-tile pipelined grid + lane masking.
    pos_big = 3.0 * jax.random.normal(k3, (3000, 2), dtype=jnp.float32)
    neg_big = 3.0 * jax.random.normal(k4, (5300, 2), dtype=jnp.float32)

    loss_big = binary_loss(pos_big, neg_big)
    jax.block_until_ready(loss_big)
    ref_big = binary_loss_ref(pos_big, neg_big)
    assert jnp.allclose(loss_big, ref_big, rtol=1e-5, atol=1e-5), (loss_big, ref_big)

    print("KERNEL_OK")
</pallas_src>

<mosaic_0001>
module attributes {stable_mosaic.version = 11 : i64} {
  func.func @_binary_loss_kernel(%arg0: i32, %arg1: memref<2x128xf32, #tpu.memory_space<vmem>>, %arg2: memref<1x1xf32, #tpu.memory_space<smem>>, %arg3: memref<1x128xf32, #tpu.memory_space<vmem>>) attributes {dimension_semantics = [#tpu.dimension_semantics<arbitrary>], iteration_bounds = array<i64: 1>, scalar_prefetch = 0 : i64, scratch_operands = 1 : i64, tpu.core_type = #tpu.core_type<tc>, window_params = [{transform_indices = @transform_0, window_bounds = array<i64: 2, 128>}, {transform_indices = @transform_1, window_bounds = array<i64: 1, 1>}]} {
    %c0_i32 = arith.constant 0 : i32
    %0 = arith.cmpi eq, %arg0, %c0_i32 : i32
    %1 = arith.extui %0 : i1 to i32
    %c0_i32_0 = arith.constant 0 : i32
    %2 = arith.cmpi ne, %1, %c0_i32_0 : i32
    scf.if %2 {
      %cst_10 = arith.constant 0.000000e+00 : f32
      %29 = vector.broadcast %cst_10 : f32 to vector<1x128xf32>
      %c0_11 = arith.constant 0 : index
      %c0_12 = arith.constant 0 : index
      %30 = vector.load %arg3[%c0_11, %c0_12] : memref<1x128xf32, #tpu.memory_space<vmem>>, vector<1x128xf32>
      tpu.vector_store %arg3[%c0_11, %c0_12], %29 {strides = array<i32>} : memref<1x128xf32, #tpu.memory_space<vmem>>, vector<1x128xf32>,
    } else {
    }
    %c0 = arith.constant 0 : index
    %c0_1 = arith.constant 0 : index
    %3 = vector.load %arg1[%c0, %c0_1] : memref<2x128xf32, #tpu.memory_space<vmem>>, vector<2x128xf32>
    %4 = vector.extract_strided_slice %3 {offsets = [0, 0], sizes = [1, 128], strides = [1, 1]} : vector<2x128xf32> to vector<1x128xf32>
    %5 = vector.extract_strided_slice %3 {offsets = [1, 0], sizes = [1, 128], strides = [1, 1]} : vector<2x128xf32> to vector<1x128xf32>
    %6 = arith.subf %4, %5 : vector<1x128xf32>
    %cst = arith.constant 0.000000e+00 : f32
    %7 = vector.broadcast %cst : f32 to vector<1x128xf32>
    %8 = arith.maximumf %6, %7 : vector<1x128xf32>
    %9 = math.absf %6 : vector<1x128xf32>
    %cst_2 = arith.constant 0.000000e+00 : f32
    %10 = vector.broadcast %cst_2 : f32 to vector<1x128xf32>
    %11 = arith.subf %10, %9 : vector<1x128xf32>
    %12 = math.exp %11 : vector<1x128xf32>
    %13 = math.log1p %12 : vector<1x128xf32>
    %14 = arith.addf %8, %13 : vector<1x128xf32>
    %15 = tpu.iota {dimensions = array<i32: 1>} : vector<1x128xi32>
    %c128_i32 = arith.constant 128 : i32
    %16 = arith.muli %arg0, %c128_i32 : i32
    %17 = vector.broadcast %16 : i32 to vector<1x128xi32>
    %18 = arith.addi %15, %17 : vector<1x128xi32>
    %c0_3 = arith.constant 0 : index
    %c0_4 = arith.constant 0 : index
    %19 = vector.load %arg3[%c0_3, %c0_4] : memref<1x128xf32, #tpu.memory_space<vmem>>, vector<1x128xf32>
    %c24_i32 = arith.constant 24 : i32
    %20 = vector.broadcast %c24_i32 : i32 to vector<1x128xi32>
    %21 = arith.cmpi slt, %18, %20 : vector<1x128xi32>
    %cst_5 = arith.constant 0.000000e+00 : f32
    %22 = vector.broadcast %cst_5 : f32 to vector<1x128xf32>
    %23 = arith.select %21, %14, %22 : vector<1x128xi1>, vector<1x128xf32>
    %24 = arith.addf %19, %23 : vector<1x128xf32>
    %c0_6 = arith.constant 0 : index
    %c0_7 = arith.constant 0 : index
    %25 = vector.load %arg3[%c0_6, %c0_7] : memref<1x128xf32, #tpu.memory_space<vmem>>, vector<1x128xf32>
    tpu.vector_store %arg3[%c0_6, %c0_7], %24 {strides = array<i32>} : memref<1x128xf32, #tpu.memory_space<vmem>>, vector<1x128xf32>,
    %c0_i32_8 = arith.constant 0 : i32
    %26 = arith.cmpi eq, %arg0, %c0_i32_8 : i32
    %27 = arith.extui %26 : i1 to i32
    %c0_i32_9 = arith.constant 0 : i32
    %28 = arith.cmpi ne, %27, %c0_i32_9 : i32
    scf.if %28 {
      %c0_10 = arith.constant 0 : index
      %c0_11 = arith.constant 0 : index
      %29 = vector.load %arg3[%c0_10, %c0_11] : memref<1x128xf32, #tpu.memory_space<vmem>>, vector<1x128xf32>
      %30 = vector.shape_cast %29 : vector<1x128xf32> to vector<1x1x128xf32>
      %cst_12 = arith.constant dense<0.000000e+00> : vector<1xf32>
      %31 = vector.multi_reduction <add>, %30, %cst_12 [1, 2] : vector<1x1x128xf32> to vector<1xf32>
      %32 = vector.shape_cast %31 : vector<1xf32> to vector<1x1x1xf32>
      %33 = vector.extract %32[0, 0, 0] : f32 from vector<1x1x1xf32>
      %cst_13 = arith.constant 0.0416666679 : f32
      %34 = arith.mulf %33, %cst_13 : f32
      %c0_14 = arith.constant 0 : index
      %c0_15 = arith.constant 0 : index
      %35 = memref.load %arg2[%c0_14, %c0_15] : memref<1x1xf32, #tpu.memory_space<smem>>
      memref.store %34, %arg2[%c0_14, %c0_15] : memref<1x1xf32, #tpu.memory_space<smem>>
    } else {
    }
    return
  }
  func.func @transform_0(%arg0: i32) -> (i32, i32) {
    %c0_i32 = arith.constant 0 : i32
    %c0_i32_0 = arith.constant 0 : i32
    return %c0_i32, %arg0 : i32, i32
  }
  func.func @transform_1(%arg0: i32) -> (i32, i32) {
    %c0_i32 = arith.constant 0 : i32
    %c0_i32_0 = arith.constant 0 : i32
    %c0_i32_1 = arith.constant 0 : i32
    return %c0_i32, %c0_i32_0 : i32, i32
  }
}

</mosaic_0001>

<bundles_post_ra>
// kernel: tpu_custom_call.1
= control target key start
LH: loop header
LB: loop body
LE: loop exit
PB: predicated region body
PF: predicated region fallthrough
CT: control target
= control target key end

     0   :  { %6 = vsyncpa [#allocation4], 0  ;;  %s148_s0 = inlined_call_operand.hbm [shape: f32[2,128], index: 0, kind: input, shape index: {}]   ;;  %s149_s1 = inlined_call_operand.hbm [shape: f32[1,1], index: 1, kind: output, shape index: {}]  }
   0x1   :  { %7 = vsyncpa [#allocation5], 0  ;;  %s129_s6 = smov [#allocation3]  }
   0x2   :  { %s14_s7 = sshll.u32 %s129_s6, 4  ;;  %s15_s7 = int_to_ptr.vmem [resolvable:$true] %s14_s7 }
   0x3   :  { %s105_s8 = scalar_lea.vmem %s15_s7, 32  ;;  %p110_p1 = scmp.lt.s32.totalorder %s15_s7, %s15_s7 }
   0x4   :  { %p106_p0 = scmp.ne.s32.totalorder %s15_s7, %s105_s8  ;;  %p111_p2 = scmp.lt.s32.totalorder %s105_s8, %s105_s8 }
   0x6   :  { %p112_p3 = por %p111_p2, %p110_p1 }
   0x8   :  { %p113_p4 = pnand %p112_p3, %p106_p0 }
   0xa   :  { %116 = shalt.err (!%p113_p4)
}
   0xb   :  { %17 = dma.hbm_to_vmem [thread:$0]  %s148_s0, 32, %s15_s7, [#allocation4]  }
   0xc   :  { %125 = dma.done.wait [#allocation4], 32  }
   0xd   :  { %126 = vsyncadd [#allocation4], 4294967264  ;;  %v130_v0 = vmov 0.0   ;;  %v26_v1 = vld [vmem:[#allocation3] sm:$0x3]  ;;  %v46_v11 = vlaneseq  ;;  %vm60_vm2 = vcmask 1040384  }
   0xe   :  { %25 = vst [vmem:[#allocation2] sm:$0x1] %v130_v0  ;;  %v28_v2 = vrot.slane %v26_v1, 1  ;;  %s131_s12 = smov [#allocation6]  }
   0xf   :  { %v47_v14 = vand.u32 127, %v46_v11 }
  0x10   :  { %v30_v3 = vsub.f32 %v26_v1, %v28_v2 }
  0x11   :  { %vm52_vm1 = vcmp.lt.s32.totalorder %v47_v14, 24 }
  0x12   :  { %v32_v4 = vand.u32 2147483647, %v30_v3  ;;  %v31_v16 = vmax.f32 %v30_v3, 0.0 }
  0x14   :  { %v33_v5 = vsub.f32 0.0, %v32_v4 }
  0x15   :  { %v51_v20 = vld [vmem:[#allocation2] sm:$0x1] }
  0x16   :  { %v34_v6 = vmul.f32 1.442695, %v33_v5 }
  0x18   :  { %93 = vpow2.f32 %v34_v6 }
  0x25   :  { %v94_v7 = vpop.eup %93 }
  0x26   :  { %v36_v8 = vadd.f32 1.0, %v94_v7  ;;  %v39_v9 = vmul.f32 -0.5, %v94_v7  ;;  %v42_v12 = vand.u32 2147483647, %v94_v7 }
  0x28   :  { %95 = vlog2.f32 %v36_v8  ;;  %v40_v10 = vadd.f32 1.0, %v39_v9  ;;  %vm43_vm0 = vcmp.lt.f32.partialorder %v42_v12, 0.0004427343 }
  0x2a   :  { %v41_v13 = vmul.f32 %v94_v7, %v40_v10 }
  0x35   :  { %v96_v15 = vpop.eup %95 }
  0x36   :  { %v38_v17 = vmul.f32 0.6931472, %v96_v15 }
  0x38   :  { %v44_v18 = vsel %vm43_vm0, %v41_v13, %v38_v17 }
  0x39   :  { %v45_v19 = vadd.f32 %v44_v18, %v31_v16 }
  0x3b   :  { %v53_v21 = vsel %vm52_vm1, %v45_v19, 0.0 }
  0x3c   :  { %v54_v22 = vadd.f32 %v53_v21, %v51_v20 }
  0x3e   :  { %55 = vst [vmem:[#allocation2] sm:$0x1] %v54_v22 }
  0x45   :  { %v59_v23 = vld [vmem:[#allocation2] sm:$0x1] }
  0x46   :  { %v61_v24 = vsel %vm60_vm2, %v59_v23, 0.0 }
  0x47   :  { %62 = vadd.xlane.f32.xlu0 %v61_v24 }
  0xd0   :  { %v63_v25 = vpop.xlane.xlu0 %62 }
  0xd1   :  { %v64_v26 = vrot.slane %v63_v25, 4 }
  0xd3   :  { %v65_v27 = vadd.f32 %v64_v26, %v63_v25 }
  0xd5   :  { %v66_v28 = vrot.slane %v65_v27, 2 }
  0xd7   :  { %v67_v29 = vadd.f32 %v66_v28, %v65_v27 }
  0xd9   :  { %v68_v30 = vrot.slane %v67_v29, 1 }
  0xdb   :  { %v69_v31 = vadd.f32 %v68_v30, %v67_v29 }
  0xdd   :  { %88 = vpush %v69_v31 }
 0x10e   :  { %s89_s0 = spop %88 }
 0x10f   :  { %s71_s11 = smul.f32 0.041666668, %s89_s0 }
 0x111   :  { %73 = sst [smem:[#allocation6]] %s71_s11 }
 0x112   :  { %81 = dma.smem_to_hbm %s131_s12, 16, %s149_s1, [#allocation5]  }
 0x113   :  { %127 = dma.done.wait [#allocation5], 16  }
 0x114   :  { %128 = vsyncadd [#allocation5], 4294967280 }
 0x115   :  { %85 = sfence }
 0x116   :  { %86 = vsyncpa [#allocation4], 1 }
 0x117   :  { %87 = vsyncpa [#allocation5], 1 }

</bundles_post_ra>
